<compile_context>
chip_gen: v6e
topology: v6e:2x2x1
jax: 0.10.0
libtpu: 0.0.40
codegen_flags: <defaults>
</compile_context>

<pallas_src>
import functools
from math import sqrt

import jax
import jax.numpy as jnp
from jax.experimental import pallas as pl
from jax.experimental.pallas import tpu as pltpu


def _cdiv(a, b):
    return -(-a // b)


def _round_up(x, m):
    return ((x + m - 1) // m) * m


def _balanced_tile(dim, max_tile, align):
    """Split `dim` into ~equal tiles (multiple of `align`, <= ~max_tile)."""
    dim_a = _round_up(dim, align)
    n = _cdiv(dim_a, max_tile)
    tile = _round_up(_cdiv(dim_a, n), align)
    padded = _round_up(dim_a, tile)
    return tile, padded


def _physical_vmem_bytes():
    try:
        return int(pltpu.get_tpu_info().vmem_capacity_bytes)
    except Exception:
        return 64 * 1024 * 1024  # conservative (v7x-sized) fallback


# --------------------------------------------------------------------------
# Kernels
# --------------------------------------------------------------------------

def _equal_linear_kernel_inplace(x_ref, wt_ref, b_ref, o_ref, *, scale):
    """f32-output path: accumulate directly into the output block."""
    k = pl.program_id(2)

    @pl.when(k == 0)
    def _():
        o_ref[...] = jnp.dot(x_ref[...], wt_ref[...],
                             preferred_element_type=jnp.float32)

    @pl.when(k > 0)
    def _():
        o_ref[...] += jnp.dot(x_ref[...], wt_ref[...],
                              preferred_element_type=jnp.float32)

    # Epilogue once per output tile: equalized-LR scale + bias, in place.
    @pl.when(k == pl.num_programs(2) - 1)
    def _():
        o_ref[...] = o_ref[...] * scale + b_ref[...]


def _equal_linear_kernel_acc(x_ref, wt_ref, b_ref, o_ref, acc_ref, *, scale):
    """Non-f32-output path: f32 VMEM accumulator, cast only in the epilogue."""
    k = pl.program_id(2)

    @pl.when(k == 0)
    def _():
        acc_ref[...] = jnp.dot(x_ref[...], wt_ref[...],
                               preferred_element_type=jnp.float32)

    @pl.when(k > 0)
    def _():
        acc_ref[...] += jnp.dot(x_ref[...], wt_ref[...],
                                preferred_element_type=jnp.float32)

    @pl.when(k == pl.num_programs(2) - 1)
    def _():
        o_ref[...] = (acc_ref[...] * scale + b_ref[...]).astype(o_ref.dtype)


# --------------------------------------------------------------------------
# Parameter preparation (do ONCE at parameter-load time, not per forward call)
# --------------------------------------------------------------------------

def prepare_equal_linear(weight_orig, bias, *, compute_dtype=None,
                         max_tk=None, max_tn=None):
    """Pre-transpose / pad / (optionally) cast the EqualLinear parameters.

    weight_orig: (out_dim, in_dim)  as stored by torch.nn.Linear
    bias:        (out_dim,)
    compute_dtype: optional MXU operand dtype (e.g. jnp.bfloat16) for the
                   weight; accumulation / scale / bias stay f32.
    """
    out_dim, in_dim = weight_orig.shape
    scale = sqrt(2.0 / in_dim)

    # Larger weight tiles on the 128 MiB-VMEM generations (v5e / v6e);
    # conservative tiles on v7x (64 MiB).
    big_vmem = _physical_vmem_bytes() >= 100 * 1024 * 1024
    if max_tk is None:
        max_tk = 4096 if big_vmem else 2048
    if max_tn is None:
        max_tn = 1024 if big_vmem else 512

    tk, Kp = _balanced_tile(in_dim, max_tk, 128)
    tn, Np = _balanced_tile(out_dim, max_tn, 128)

    w_dtype = compute_dtype if compute_dtype is not None else weight_orig.dtype
    # Transpose once so the in-kernel RHS tile is (K, N): contraction on
    # sublanes, lane-dense output N.
    w_t = jnp.asarray(weight_orig).T.astype(w_dtype)          # (in_dim, out_dim)
    if (Kp, Np) != (in_dim, out_dim):
        w_t = jnp.pad(w_t, ((0, Kp - in_dim), (0, Np - out_dim)))

    b = jnp.asarray(bias).astype(jnp.float32)
    if Np != out_dim:
        b = jnp.pad(b, (0, Np - out_dim))
    b = b.reshape(1, Np)

    return dict(w_t=w_t, bias=b, scale=scale,
                in_dim=in_dim, out_dim=out_dim,
                Kp=Kp, Np=Np, tk=tk, tn=tn)


# --------------------------------------------------------------------------
# Forward pass
# --------------------------------------------------------------------------

def equal_linear(x, params):
    """EqualLinear forward: x (B, in_dim) -> (B, out_dim) in x's dtype."""
    B, in_dim = x.shape
    assert in_dim == params["in_dim"]

    out_dtype = x.dtype
    # MXU operands must share a dtype; the weight dtype was fixed at prepare
    # time (possibly bf16).  Accumulation / scale / bias remain f32.
    x = x.astype(params["w_t"].dtype)

    w_t, b = params["w_t"], params["bias"]
    Kp, Np, tk, tn = params["Kp"], params["Np"], params["tk"], params["tn"]
    scale = params["scale"]

    bpe = jnp.dtype(x.dtype).itemsize
    out_bpe = jnp.dtype(out_dtype).itemsize
    sublane = 16 if bpe == 2 else 8

    tm, Mp = _balanced_tile(B, 256, sublane)

    # v7x has 2 TensorCores: make sure at least one "parallel" axis has >=2
    # blocks when the problem allows it (typical mapping-network shapes give a
    # (1, 1, K) grid otherwise and one TC idles).
    if Mp // tm == 1 and Np // tn == 1 and Np // 128 >= 2:
        m = Np // 128
        d = m // 2
        while d > 1 and m % d != 0:
            d -= 1
        tn = max(d, 1) * 128

    xp = x if (Mp == B and Kp == in_dim) else jnp.pad(
        x, ((0, Mp - B), (0, Kp - in_dim)))

    grid = (Mp // tm, Np // tn, Kp // tk)
    use_scratch = out_dtype != jnp.float32

    # Exact VMEM budget: 2x double-buffered x / W / bias / out blocks, plus the
    # f32 accumulator when used, plus ~4 MiB headroom for internal scratch.
    # Cap leaves >=16 MiB of physical VMEM (48 MiB on v7x, ~112 MiB v5e/v6e).
    tile_bytes = (2 * tm * tk * bpe            # x blocks
                  + 2 * tk * tn * bpe          # weight blocks
                  + 2 * 8 * tn * 4             # bias blocks (sublane-padded)
                  + 2 * tm * tn * out_bpe      # output blocks
                  + (tm * tn * 4 if use_scratch else 0))
    vmem_cap = max(_physical_vmem_bytes() - 16 * 1024 * 1024,
                   32 * 1024 * 1024)
    vmem_limit = int(min(max(tile_bytes + 4 * 1024 * 1024,
                             16 * 1024 * 1024), vmem_cap))

    cost = pl.CostEstimate(
        flops=2 * Mp * Kp * Np,
        transcendentals=0,
        bytes_accessed=(Mp * Kp * bpe + Kp * Np * bpe + Np * 4
                        + Mp * Np * out_bpe),
    )

    if use_scratch:
        kernel = functools.partial(_equal_linear_kernel_acc, scale=scale)
        scratch_shapes = [pltpu.VMEM((tm, tn), jnp.float32)]
    else:
        kernel = functools.partial(_equal_linear_kernel_inplace, scale=scale)
        scratch_shapes = []

    out_padded = pl.pallas_call(
        kernel,
        out_shape=jax.ShapeDtypeStruct((Mp, Np), out_dtype),
        grid_spec=pltpu.PrefetchScalarGridSpec(
            num_scalar_prefetch=0,
            grid=grid,
            in_specs=[
                pl.BlockSpec((tm, tk), lambda i, j, k: (i, k)),
                pl.BlockSpec((tk, tn), lambda i, j, k: (k, j)),
                pl.BlockSpec((1, tn), lambda i, j, k: (0, j)),
            ],
            out_specs=pl.BlockSpec((tm, tn), lambda i, j, k: (i, j)),
            scratch_shapes=scratch_shapes,
        ),
        compiler_params=pltpu.CompilerParams(
            dimension_semantics=("parallel", "parallel", "arbitrary"),
            vmem_limit_bytes=vmem_limit,
        ),
        cost_estimate=cost,
    )(xp, w_t, b)

    return out_padded[:B, :params["out_dim"]]


# --------------------------------------------------------------------------
# Self-test
# --------------------------------------------------------------------------

if __name__ == "__main__":
    key = jax.random.PRNGKey(0)
    k_x, k_w, k_x2, k_w2 = jax.random.split(key, 4)

    # --- Test 1: module-sized shapes, f32 path (no scratch, single K step) ---
    batch, in_dim, out_dim = 2, 32, 16
    x = jax.random.normal(k_x, (batch, in_dim), dtype=jnp.float32)
    weight_orig = jax.random.normal(k_w, (out_dim, in_dim), dtype=jnp.float32)
    bias = jnp.zeros((out_dim,), dtype=jnp.float32)

    params = prepare_equal_linear(weight_orig, bias)
    out = jax.block_until_ready(equal_linear(x, params))

    scale = sqrt(2.0 / in_dim)
    ref = x @ (scale * weight_orig).T + bias
    assert out.shape == ref.shape, "shape mismatch vs reference"
    assert jnp.allclose(out, ref, atol=1e-5, rtol=1e-5), "f32 mismatch vs reference"

    # --- Test 2: bf16 compute + bf16 output (scratch-accumulator path) ---
    params_bf16 = prepare_equal_linear(weight_orig, bias,
                                       compute_dtype=jnp.bfloat16)
    out_bf16 = jax.block_until_ready(
        equal_linear(x.astype(jnp.bfloat16), params_bf16))
    assert out_bf16.dtype == jnp.bfloat16
    assert jnp.allclose(out_bf16.astype(jnp.float32), ref, atol=1e-1, rtol=1e-1), \
        "bf16 mismatch vs reference"

    # --- Test 3: multi-K-step accumulation + N-axis split for 2 TensorCores ---
    b2, in2, out2 = 4, 256, 384
    x2 = jax.random.normal(k_x2, (b2, in2), dtype=jnp.float32)
    w2 = jax.random.normal(k_w2, (out2, in2), dtype=jnp.float32)
    bias2 = jnp.zeros((out2,), dtype=jnp.float32)
    params2 = prepare_equal_linear(w2, bias2, max_tk=128)   # force K grid > 1
    out2_k = jax.block_until_ready(equal_linear(x2, params2))
    scale2 = sqrt(2.0 / in2)
    ref2 = jnp.dot(x2, (scale2 * w2).T,
                   precision=jax.lax.Precision.HIGHEST) + bias2
    assert out2_k.shape == ref2.shape, "shape mismatch vs reference (multi-K)"
    assert jnp.allclose(out2_k, ref2, atol=1e-3, rtol=1e-3), \
        "multi-K mismatch vs reference"

    print("KERNEL_OK")
</pallas_src>

<mosaic_0001>
module attributes {stable_mosaic.version = 11 : i64} {
  func.func @_equal_linear_kernel_inplace(%arg0: i32, %arg1: i32, %arg2: i32, %arg3: memref<8x128xf32, #tpu.memory_space<vmem>>, %arg4: memref<128x128xf32, #tpu.memory_space<vmem>>, %arg5: memref<1x128xf32, #tpu.memory_space<vmem>>, %arg6: memref<8x128xf32, #tpu.memory_space<vmem>>) attributes {dimension_semantics = [#tpu.dimension_semantics<parallel>, #tpu.dimension_semantics<parallel>, #tpu.dimension_semantics<arbitrary>], iteration_bounds = array<i64: 1, 1, 1>, scalar_prefetch = 0 : i64, scratch_operands = 0 : i64, tpu.core_type = #tpu.core_type<tc>, window_params = [{transform_indices = @transform_0, window_bounds = array<i64: 8, 128>}, {transform_indices = @transform_1, window_bounds = array<i64: 128, 128>}, {transform_indices = @transform_2, window_bounds = array<i64: 1, 128>}, {transform_indices = @transform_3, window_bounds = array<i64: 8, 128>}]} {
    %c0_i32 = arith.constant 0 : i32
    %0 = arith.cmpi eq, %arg2, %c0_i32 : i32
    %1 = arith.extui %0 : i1 to i32
    %c0_i32_0 = arith.constant 0 : i32
    %2 = arith.cmpi ne, %1, %c0_i32_0 : i32
    scf.if %2 {
      %c0 = arith.constant 0 : index
      %c0_5 = arith.constant 0 : index
      %9 = vector.load %arg3[%c0, %c0_5] : memref<8x128xf32, #tpu.memory_space<vmem>>, vector<8x128xf32>
      %c0_6 = arith.constant 0 : index
      %c0_7 = arith.constant 0 : index
      %10 = vector.load %arg4[%c0_6, %c0_7] : memref<128x128xf32, #tpu.memory_space<vmem>>, vector<128x128xf32>
      %cst = arith.constant dense<0.000000e+00> : vector<8x128xf32>
      %11 = tpu.matmul %9, %10, %cst {dimension_numbers = #tpu.dot_dimension_numbers<[1], [0], [0], [1], [0, 0, 1, 1], [], []>} : vector<8x128xf32>, vector<128x128xf32>, vector<8x128xf32> -> vector<8x128xf32>
      %c0_8 = arith.constant 0 : index
      %c0_9 = arith.constant 0 : index
      %12 = vector.load %arg6[%c0_8, %c0_9] : memref<8x128xf32, #tpu.memory_space<vmem>>, vector<8x128xf32>
      tpu.vector_store %arg6[%c0_8, %c0_9], %11 {strides = array<i32>} : memref<8x128xf32, #tpu.memory_space<vmem>>, vector<8x128xf32>,
    } else {
    }
    %c0_i32_1 = arith.constant 0 : i32
    %3 = arith.cmpi sgt, %arg2, %c0_i32_1 : i32
    %4 = arith.extui %3 : i1 to i32
    %c0_i32_2 = arith.constant 0 : i32
    %5 = arith.cmpi ne, %4, %c0_i32_2 : i32
    scf.if %5 {
      %c0 = arith.constant 0 : index
      %c0_5 = arith.constant 0 : index
      %9 = vector.load %arg6[%c0, %c0_5] : memref<8x128xf32, #tpu.memory_space<vmem>>, vector<8x128xf32>
      %c0_6 = arith.constant 0 : index
      %c0_7 = arith.constant 0 : index
      %10 = vector.load %arg3[%c0_6, %c0_7] : memref<8x128xf32, #tpu.memory_space<vmem>>, vector<8x128xf32>
      %c0_8 = arith.constant 0 : index
      %c0_9 = arith.constant 0 : index
      %11 = vector.load %arg4[%c0_8, %c0_9] : memref<128x128xf32, #tpu.memory_space<vmem>>, vector<128x128xf32>
      %cst = arith.constant dense<0.000000e+00> : vector<8x128xf32>
      %12 = tpu.matmul %10, %11, %cst {dimension_numbers = #tpu.dot_dimension_numbers<[1], [0], [0], [1], [0, 0, 1, 1], [], []>} : vector<8x128xf32>, vector<128x128xf32>, vector<8x128xf32> -> vector<8x128xf32>
      %13 = arith.addf %9, %12 : vector<8x128xf32>
      %c0_10 = arith.constant 0 : index
      %c0_11 = arith.constant 0 : index
      %14 = vector.load %arg6[%c0_10, %c0_11] : memref<8x128xf32, #tpu.memory_space<vmem>>, vector<8x128xf32>
      tpu.vector_store %arg6[%c0_10, %c0_11], %13 {strides = array<i32>} : memref<8x128xf32, #tpu.memory_space<vmem>>, vector<8x128xf32>,
    } else {
    }
    %c0_i32_3 = arith.constant 0 : i32
    %6 = arith.cmpi eq, %arg2, %c0_i32_3 : i32
    %7 = arith.extui %6 : i1 to i32
    %c0_i32_4 = arith.constant 0 : i32
    %8 = arith.cmpi ne, %7, %c0_i32_4 : i32
    scf.if %8 {
      %c0 = arith.constant 0 : index
      %c0_5 = arith.constant 0 : index
      %9 = vector.load %arg6[%c0, %c0_5] : memref<8x128xf32, #tpu.memory_space<vmem>>, vector<8x128xf32>
      %cst = arith.constant 2.500000e-01 : f32
      %10 = vector.broadcast %cst : f32 to vector<8x128xf32>
      %11 = arith.mulf %9, %10 : vector<8x128xf32>
      %c0_6 = arith.constant 0 : index
      %c0_7 = arith.constant 0 : index
      %12 = vector.load %arg5[%c0_6, %c0_7] : memref<1x128xf32, #tpu.memory_space<vmem>>, vector<1x128xf32>
      %13 = vector.broadcast %12 : vector<1x128xf32> to vector<8x128xf32>
      %14 = arith.addf %11, %13 : vector<8x128xf32>
      %c0_8 = arith.constant 0 : index
      %c0_9 = arith.constant 0 : index
      %15 = vector.load %arg6[%c0_8, %c0_9] : memref<8x128xf32, #tpu.memory_space<vmem>>, vector<8x128xf32>
      tpu.vector_store %arg6[%c0_8, %c0_9], %14 {strides = array<i32>} : memref<8x128xf32, #tpu.memory_space<vmem>>, vector<8x128xf32>,
    } else {
    }
    return
  }
  func.func @transform_0(%arg0: i32, %arg1: i32, %arg2: i32) -> (i32, i32) {
    %c0_i32 = arith.constant 0 : i32
    return %arg0, %arg2 : i32, i32
  }
  func.func @transform_1(%arg0: i32, %arg1: i32, %arg2: i32) -> (i32, i32) {
    %c0_i32 = arith.constant 0 : i32
    return %arg2, %arg1 : i32, i32
  }
  func.func @transform_2(%arg0: i32, %arg1: i32, %arg2: i32) -> (i32, i32) {
    %c0_i32 = arith.constant 0 : i32
    %c0_i32_0 = arith.constant 0 : i32
    return %c0_i32, %arg1 : i32, i32
  }
  func.func @transform_3(%arg0: i32, %arg1: i32, %arg2: i32) -> (i32, i32) {
    %c0_i32 = arith.constant 0 : i32
    return %arg0, %arg1 : i32, i32
  }
}

</mosaic_0001>

<bundles_post_ra>
// kernel: tpu_custom_call.1
= control target key start
LH: loop header
LB: loop body
LE: loop exit
PB: predicated region body
PF: predicated region fallthrough
CT: control target
= control target key end

     0   :  { %8 = vsyncpa [#allocation3], 0  ;;  %s422_s0 = inlined_call_operand.hbm [shape: f32[8,128], index: 0, kind: input, shape index: {}]   ;;  %s423_s1 = inlined_call_operand.hbm [shape: f32[128,128], index: 1, kind: input, shape index: {}]   ;;  %s424_s2 = inlined_call_operand.vmem [shape: f32[1,128], index: 2, kind: input, shape index: {}]   ;;  %s425_s3 = inlined_call_operand.hbm [shape: f32[8,128], index: 3, kind: output, shape index: {}]  }
   0x1   :  { %9 = vsyncpa [#allocation6], 0 }
   0x2   :  { %10 = vsyncpa [#allocation4], 0  ;;  %s383_s12 = smov [#allocation2]   ;;  %s384_s14 = smov [#allocation5]  }
   0x3   :  { %s17_s13 = sshll.u32 %s383_s12, 4  ;;  %s26_s15 = sshll.u32 %s384_s14, 4  ;;  %s18_s13 = int_to_ptr.vmem [resolvable:$true] %s17_s13  ;;  %s27_s15 = int_to_ptr.vmem [resolvable:$true] %s26_s15 }
   0x4   :  { %s325_s16 = scalar_lea.vmem %s18_s13, 128  ;;  %p330_p1 = scmp.lt.s32.totalorder %s18_s13, %s18_s13 }
   0x5   :  { %p326_p0 = scmp.ne.s32.totalorder %s18_s13, %s325_s16  ;;  %p331_p2 = scmp.lt.s32.totalorder %s325_s16, %s325_s16 }
   0x7   :  { %p332_p3 = por %p331_p2, %p330_p1 }
   0x9   :  { %p333_p4 = pnand %p332_p3, %p326_p0 }
   0xb   :  { %336 = shalt.err (!%p333_p4)
}
   0xc   :  { %20 = dma.hbm_to_vmem [thread:$0]  %s422_s0, 128, %s18_s13, [#allocation3]  }
   0xd   :  { %s345_s19 = scalar_lea.vmem %s27_s15, 2048  ;;  %p350_p6 = scmp.lt.s32.totalorder %s27_s15, %s27_s15 }
   0xe   :  { %p346_p5 = scmp.ne.s32.totalorder %s27_s15, %s345_s19  ;;  %p351_p7 = scmp.lt.s32.totalorder %s345_s19, %s345_s19 }
  0x10   :  { %p352_p8 = por %p351_p7, %p350_p6 }
  0x12   :  { %p353_p9 = pnand %p352_p8, %p346_p5 }
  0x14   :  { %356 = shalt.err (!%p353_p9)
}
  0x15   :  { %s385_s20 = smov 128   ;;  %s386_s21 = smov 8  }
  0x16   :  { %32 = dma.hbm_to_vmem [thread:$0]  %s423_s1, 2048, %s27_s15, [#allocation6], %s385_s20, %s385_s20, %s386_s21  }
  0x17   :  { %377 = dma.done.wait [#allocation3], 128  }
  0x18   :  { %378 = vsyncadd [#allocation3], 4294967168 }
  0x19   :  { %379 = dma.done.wait [#allocation6], 2048  }
  0x1a   :  { %380 = vsyncadd [#allocation6], 4294965248  ;;  %v387_v0 = vmov 0.0   ;;  %vm388_vm0 = vmmov 0   ;;  %v61_v1 = vld [vmem:[#allocation5 + $0x78] sm:$0xff]  ;;  %v60_v2 = vld [vmem:[#allocation5 + $0x70] sm:$0xff] }
  0x1b   :  { %275 = vmatprep.subr.mxu0 %v387_v0  ;;  %307 = vmatprep.mubr.msk.f32.mxu0 %vm388_vm0, %v387_v0  ;;  %v59_v3 = vld [vmem:[#allocation5 + $0x68] sm:$0xff]  ;;  %v58_v4 = vld [vmem:[#allocation5 + $0x60] sm:$0xff]  ;;  %v57_v5 = vld [vmem:[#allocation5 + $0x58] sm:$0xff]  ;;  %s389_s24 = smov [#allocation7]  }
  0x1c   :  { %276 = vmatpush3.msra.mxu0 %v61_v1  ;;  %v56_v6 = vld [vmem:[#allocation5 + $0x50] sm:$0xff]  ;;  %v55_v7 = vld [vmem:[#allocation5 + $0x48] sm:$0xff]  ;;  %v54_v8 = vld [vmem:[#allocation5 + $0x40] sm:$0xff]  ;;  %s247_s25 = sshll.u32 %s389_s24, 4  ;;  %s248_s25 = int_to_ptr.vmem [resolvable:$true] %s247_s25 }
  0x1d   :  { %277 = vmatprep.subr.mxu0 %v387_v0  ;;  %v53_v9 = vld [vmem:[#allocation5 + $0x38] sm:$0xff]  ;;  %v52_v10 = vld [vmem:[#allocation5 + $0x30] sm:$0xff]  ;;  %v51_v11 = vld [vmem:[#allocation5 + $0x28] sm:$0xff]  ;;  %s357_s26 = scalar_lea.vmem %s248_s25, 128  ;;  %p362_p11 = scmp.lt.s32.totalorder %s248_s25, %s248_s25 }
  0x1e   :  { %278 = vmatpush3.msra.mxu0 %v60_v2  ;;  %v50_v12 = vld [vmem:[#allocation5 + $0x20] sm:$0xff]  ;;  %v49_v13 = vld [vmem:[#allocation5 + $0x18] sm:$0xff]  ;;  %v48_v14 = vld [vmem:[#allocation5 + $0x10] sm:$0xff]  ;;  %p358_p10 = scmp.ne.s32.totalorder %s248_s25, %s357_s26  ;;  %p363_p12 = scmp.lt.s32.totalorder %s357_s26, %s357_s26 }
  0x1f   :  { %279 = vmatprep.subr.mxu0 %v387_v0  ;;  %v47_v15 = vld [vmem:[#allocation5 + $0x8] sm:$0xff]  ;;  %v46_v16 = vld [vmem:[#allocation5] sm:$0xff]  ;;  %v45_v17 = vld [vmem:[#allocation2] sm:$0xff] }
  0x20   :  { %280 = vmatpush3.msra.mxu0 %v59_v3  ;;  %v257_v19 = vld [vmem:[%s424_s2] ss:$0 sm:$0xff]  ;;  %p364_p13 = por %p363_p12, %p362_p11 }
  0x21   :  { %281 = vmatprep.subr.mxu0 %v387_v0 }
  0x22   :  { %282 = vmatpush3.msra.mxu0 %v58_v4  ;;  %p365_p0 = pnand %p364_p13, %p358_p10 }
  0x23   :  { %283 = vmatprep.subr.mxu0 %v387_v0 }
  0x24   :  { %284 = vmatpush3.msra.mxu0 %v57_v5 }
  0x25   :  { %285 = vmatprep.subr.mxu0 %v387_v0 }
  0x26   :  { %286 = vmatpush3.msra.mxu0 %v56_v6 }
  0x27   :  { %287 = vmatprep.subr.mxu0 %v387_v0 }
  0x28   :  { %288 = vmatpush3.msra.mxu0 %v55_v7 }
  0x29   :  { %289 = vmatprep.subr.mxu0 %v387_v0 }
  0x2a   :  { %290 = vmatpush3.msra.mxu0 %v54_v8 }
  0x2b   :  { %291 = vmatprep.subr.mxu0 %v387_v0 }
  0x2c   :  { %292 = vmatpush3.msra.mxu0 %v53_v9 }
  0x2d   :  { %293 = vmatprep.subr.mxu0 %v387_v0 }
  0x2e   :  { %294 = vmatpush3.msra.mxu0 %v52_v10 }
  0x2f   :  { %295 = vmatprep.subr.mxu0 %v387_v0 }
  0x30   :  { %296 = vmatpush3.msra.mxu0 %v51_v11 }
  0x31   :  { %297 = vmatprep.subr.mxu0 %v387_v0 }
  0x32   :  { %298 = vmatpush3.msra.mxu0 %v50_v12 }
  0x33   :  { %299 = vmatprep.subr.mxu0 %v387_v0 }
  0x34   :  { %300 = vmatpush3.msra.mxu0 %v49_v13 }
  0x35   :  { %301 = vmatprep.subr.mxu0 %v387_v0 }
  0x36   :  { %302 = vmatpush3.msra.mxu0 %v48_v14 }
  0x37   :  { %303 = vmatprep.subr.mxu0 %v387_v0 }
  0x38   :  { %304 = vmatpush3.msra.mxu0 %v47_v15 }
  0x39   :  { %305 = vmatprep.subr.mxu0 %v387_v0 }
  0x3a   :  { %306 = vmatpush3.msra.mxu0 %v46_v16 }
  0x3b   :  { %308 = vmatmul.mubr.f32.vlgmr.msra.gmra.mxu0 %v45_v17 }
  0xfb   :  { %v128_v18 = vpop.f32.mrf.mxu0 }
  0xfc   :  { %v231_v20 = vmul.f32 0.25, %v128_v18 }
  0xfd   :  { %v309_v21 = vpop.f32.mrf.mxu0 }
  0xfe   :  { %v239_v22 = vadd.f32 %v257_v19, %v231_v20 }
 0x100   :  { %240 = vst [vmem:[#allocation7] sm:$0xff] %v239_v22 }
 0x101   :  { %368 = shalt.err (!%p365_p0)
}
 0x102   :  { %250 = dma.vmem_to_hbm [thread:$0]  %s248_s25, 128, %s425_s3, [#allocation4]  }
 0x103   :  { %381 = dma.done.wait [#allocation4], 128  }
 0x104   :  { %382 = vsyncadd [#allocation4], 4294967168 }
 0x105   :  { %254 = vsyncpa [#allocation3], 1 }
 0x106   :  { %255 = vsyncpa [#allocation6], 1 }
 0x107   :  { %256 = vsyncpa [#allocation4], 1 }

</bundles_post_ra>
